<compile_context>
chip_gen: v7x
topology: tpu7x:2x2x1
jax: 0.10.0
libtpu: 0.0.40
codegen_flags: <defaults>
</compile_context>

<pallas_src>
import functools
import math

import jax
import jax.numpy as jnp
from jax.experimental import pallas as pl
from jax.experimental.pallas import tpu as pltpu


# --------------------------------------------------------------------------
# Per-row math (shared by both kernels)
# --------------------------------------------------------------------------
def _per_sample_loss(x, lab, *, alpha, beta, clamp_val, loss_weight):
    """Row-wise SCE loss for one (TN, C) f32 logits tile and (TN, 1) int32 labels."""
    tn, c = x.shape

    # Stable softmax / log-softmax pieces (shared between CE and RCE).
    m = jnp.max(x, axis=-1, keepdims=True)                     # (TN, 1)
    e = jnp.exp(x - m)                                         # (TN, C)
    s = jnp.sum(e, axis=-1, keepdims=True)                     # (TN, 1)
    inv_s = pl.reciprocal(s, approx=False)                     # one per-row reciprocal
    lse = m + jnp.log(s)                                       # logsumexp, (TN, 1)

    # One-hot of the label via iota compare (no gather needed).
    col = jax.lax.broadcasted_iota(jnp.int32, (tn, c), 1)
    hot = col == lab                                           # (TN, C) bool
    x_lab = jnp.sum(jnp.where(hot, x, 0.0), axis=-1, keepdims=True)   # x[label]
    # TODO(synk): negative / out-of-range labels silently yield x[label] == 0
    # instead of raising like torch.nn.functional.cross_entropy.

    # --- CE: logsumexp(x) - x[label] ---
    ce = lse - x_lab                                           # (TN, 1)

    # --- RCE: -sum(clip(softmax) * log(clip(one_hot)))
    #        = -log(clamp_val) * (sum_j clip(p_j) - clip(p_label)) ---
    # VALU trim: upper clamp to 1.0 is a no-op (softmax <= 1) and
    #   sum_j clip(p_j, 1e-7, 1) = sum_j max(e_j, 1e-7*s) * (1/s)
    # which drops the (TN, C) multiply and both clip ops per element.
    eps_s = 1e-7 * s                                           # (TN, 1)
    pred_sum = jnp.sum(jnp.maximum(e, eps_s), axis=-1, keepdims=True) * inv_s
    e_lab = jnp.exp(x_lab - m)                                 # (TN, 1), cheap EUP op
    p_lab = jnp.maximum(e_lab, eps_s) * inv_s                  # clipped softmax at label
    neg_log_cv = -math.log(min(float(clamp_val), 1.0))
    rce = neg_log_cv * (pred_sum - p_lab)                      # (TN, 1)

    return loss_weight * (alpha * ce + beta * rce)             # (TN, 1)


# --------------------------------------------------------------------------
# Kernels
# --------------------------------------------------------------------------
def _sce_per_sample_kernel(x_ref, lab_ref, out_ref, *, alpha, beta, clamp_val,
                           loss_weight):
    loss = _per_sample_loss(x_ref[...].astype(jnp.float32), lab_ref[...],
                            alpha=alpha, beta=beta, clamp_val=clamp_val,
                            loss_weight=loss_weight)
    out_ref[...] = loss                                        # (TN, 1)


def _sce_partial_sum_kernel(x_ref, lab_ref, out_ref, *, n_valid, alpha, beta,
                            clamp_val, loss_weight):
    loss = _per_sample_loss(x_ref[...].astype(jnp.float32), lab_ref[...],
                            alpha=alpha, beta=beta, clamp_val=clamp_val,
                            loss_weight=loss_weight)
    tn = loss.shape[0]
    # Mask padded rows of the (possibly ragged) last tile so they do not
    # contaminate the batch sum (also squashes NaN/Inf from padded garbage).
    row = jax.lax.broadcasted_iota(jnp.int32, (tn, 1), 0)
    valid = (pl.program_id(0) * tn + row) < n_valid
    partial = jnp.sum(jnp.where(valid, loss, 0.0), axis=0, keepdims=True)   # (1, 1)
    # Lane-dense (8, 128) output block: a single unmasked vector store per tile.
    out_ref[...] = jnp.broadcast_to(partial, (8, 128))


# --------------------------------------------------------------------------
# Hardware-aware sizing helpers
# --------------------------------------------------------------------------
def _vmem_capacity_bytes():
    """Physical VMEM per TensorCore: 128 MiB on v4/v5e/v6e, 64 MiB on v7x."""
    try:
        cap = int(pltpu.get_tpu_info().vmem_capacity_bytes)
        return max(32 << 20, min(cap, 128 << 20))
    except Exception:
        pass
    try:
        kind = jax.devices()[0].device_kind.lower()
        if any(t in kind for t in ("v7", "tpu7", "7x")):
            return 64 << 20
        return 128 << 20
    except Exception:
        return 64 << 20           # conservative: safe for every current generation


def _is_v7x():
    try:
        kind = jax.devices()[0].device_kind.lower()
        return any(t in kind for t in ("v7", "tpu7", "7x"))
    except Exception:
        return False


def _batch_dim_semantics(num_tiles, core_parallel=None):
    """Pick the grid-axis semantics: CORE_PARALLEL shards the batch tiles
    across v7x's two TensorCores; PARALLEL elsewhere (megacore handled by XLA)."""
    if core_parallel is None:
        core_parallel = _is_v7x()
    if core_parallel and num_tiles > 1:
        return (getattr(pltpu, "CORE_PARALLEL", pltpu.PARALLEL),)
    return (pltpu.PARALLEL,)


def _pick_tile_n(n, c, itemsize, vmem_cap):
    """Batch-tile size: as large as a ~40%-of-VMEM budget allows (per-grid-step
    overhead is ~0.35us / ~600 cycles, so bigger tiles amortize it and push the
    kernel toward the HBM roofline), generation aware (v7x has half the VMEM of
    v5e/v6e) and dtype aware (bf16 wants TN % 16 == 0, int8/fp8 % 32)."""
    mult = {4: 8, 2: 16, 1: 32}.get(itemsize, 8)
    c_pad = max(1, pl.cdiv(c, 128)) * 128        # lanes pad C to a multiple of 128
    per_row = (2 * c_pad * itemsize              # double-buffered logits tile
               + 6 * c_pad * 4                   # f32 temporaries (e, iota, masks, ...)
               + 2 * 128 * 4                     # (TN,1) labels, lane-padded, x2 buffers
               + 2 * 128 * 4)                    # (TN,1) per-sample out block, x2 buffers
    budget = int(0.40 * vmem_cap)                # leave headroom for compiler scratch
    tn = max(mult, budget // per_row)
    if tn >= n:
        return n                                 # single full-extent block
    return max(mult, (tn // mult) * mult)


# --------------------------------------------------------------------------
# Public wrapper
# --------------------------------------------------------------------------
def sce_loss(cls_score, label, weight=None, *, alpha=1.0, beta=1.0,
             clamp_val=1e-4, reduction="mean", loss_weight=1.0,
             avg_factor=None, reduction_override=None, tile_n=None,
             core_parallel=None, logits_buffers=2):
    """Pallas-backed SCELoss forward."""
    assert reduction_override in (None, "none", "mean", "sum")
    reduction = reduction_override if reduction_override else reduction
    assert reduction in ("none", "mean", "sum")

    n, c = cls_score.shape
    lab2d = label.astype(jnp.int32).reshape(n, 1)

    vmem_cap = _vmem_capacity_bytes()
    tn = tile_n if tile_n is not None else _pick_tile_n(
        n, c, cls_score.dtype.itemsize, vmem_cap)
    num_tiles = pl.cdiv(n, tn)

    # Logits tile (classes on lanes).  Optional deeper buffering (v5e sweep knob).
    if logits_buffers and logits_buffers != 2:
        logits_spec = pl.BlockSpec((tn, c), lambda i: (i, 0),
                                   pipeline_mode=pl.Buffered(logits_buffers))
    else:
        logits_spec = pl.BlockSpec((tn, c), lambda i: (i, 0))
    in_specs = [
        logits_spec,
        pl.BlockSpec((tn, 1), lambda i: (i, 0)),    # labels tile
    ]

    # Raise the scoped-VMEM limit to match the tile budget (v5e default is 16 MiB).
    vmem_limit = int(min(0.6 * vmem_cap, 100 * (1 << 20)))
    compiler_params = pltpu.CompilerParams(
        dimension_semantics=_batch_dim_semantics(num_tiles, core_parallel),
        vmem_limit_bytes=vmem_limit)

    common = dict(alpha=float(alpha), beta=float(beta),
                  clamp_val=float(clamp_val), loss_weight=float(loss_weight))

    # Fused batch-reduction path (the common case: weight=None, mean/sum).
    if weight is None and reduction in ("mean", "sum"):
        out = pl.pallas_call(
            functools.partial(_sce_partial_sum_kernel, n_valid=n, **common),
            out_shape=jax.ShapeDtypeStruct((num_tiles * 8, 128), jnp.float32),
            grid=(num_tiles,),
            in_specs=in_specs,
            out_specs=pl.BlockSpec((8, 128), lambda i: (i, 0)),
            compiler_params=compiler_params,
        )(cls_score, lab2d)
        total = jnp.sum(out[0::8, 0])               # sum of num_tiles partials
        if avg_factor is not None:
            if reduction == "mean":
                return total / avg_factor
            raise ValueError('avg_factor can not be used with reduction="sum"')
        return total / n if reduction == "mean" else total

    # Per-sample path (reduction='none' and/or per-sample weights).
    per_sample = pl.pallas_call(
        functools.partial(_sce_per_sample_kernel, **common),
        out_shape=jax.ShapeDtypeStruct((n, 1), jnp.float32),
        grid=(num_tiles,),
        in_specs=in_specs,
        out_specs=pl.BlockSpec((tn, 1), lambda i: (i, 0)),
        compiler_params=compiler_params,
    )(cls_score, lab2d)[:, 0]

    # weight_reduce_loss glue (batch reduce only; per-class math is in-kernel).
    if weight is not None:
        per_sample = per_sample * weight.astype(per_sample.dtype)
    if avg_factor is None:
        if reduction == "none":
            return per_sample
        if reduction == "sum":
            return jnp.sum(per_sample)
        return jnp.mean(per_sample)
    if reduction == "mean":
        return jnp.sum(per_sample) / avg_factor
    if reduction == "none":
        return per_sample
    raise ValueError('avg_factor can not be used with reduction="sum"')


# --------------------------------------------------------------------------
# Pure-JAX reference (mirrors the PyTorch module, weight=None)
# --------------------------------------------------------------------------
def _sce_loss_ref(cls_score, label, *, alpha, beta, clamp_val, loss_weight,
                  reduction="mean"):
    x = cls_score.astype(jnp.float32)
    n, c = x.shape
    logp = jax.nn.log_softmax(x, axis=1)
    ce = -logp[jnp.arange(n), label]
    pred = jnp.clip(jax.nn.softmax(x, axis=1), 1e-7, 1.0)
    oh = jnp.clip(jax.nn.one_hot(label, c, dtype=pred.dtype), clamp_val, 1.0)
    rce = -jnp.sum(pred * jnp.log(oh), axis=1)
    loss = alpha * ce + beta * rce
    if reduction == "mean":
        loss = jnp.mean(loss)
    elif reduction == "sum":
        loss = jnp.sum(loss)
    return loss_weight * loss


if __name__ == "__main__":
    key = jax.random.PRNGKey(0)
    k1, k2, k3, k4, k5, k6, k7 = jax.random.split(key, 7)

    alpha, beta, clamp_val, loss_weight = 0.5, 1.0, 1e-4, 1.0
    common = dict(alpha=alpha, beta=beta, clamp_val=clamp_val,
                  loss_weight=loss_weight)

    # Primary small shape: (N, C) classification logits, auto tile.
    N, C = 8, 32
    x = jax.random.normal(k1, (N, C), dtype=jnp.float32)
    y = jax.random.randint(k2, (N,), 0, C, dtype=jnp.int32)

    out_mean = jax.block_until_ready(sce_loss(x, y, reduction="mean", **common))
    ref_mean = _sce_loss_ref(x, y, reduction="mean", **common)
    assert jnp.allclose(out_mean, ref_mean, rtol=1e-4, atol=1e-5), (out_mean, ref_mean)

    # Ragged shape with a forced small tile: exercises batch tiling, the
    # partial last tile, its mask and all three reductions.
    N2, C2 = 100, 37
    x2 = jax.random.normal(k3, (N2, C2), dtype=jnp.float32)
    y2 = jax.random.randint(k4, (N2,), 0, C2, dtype=jnp.int32)

    for red in ("mean", "sum", "none"):
        o = jax.block_until_ready(
            sce_loss(x2, y2, reduction=red, tile_n=32, **common))
        r = _sce_loss_ref(x2, y2, reduction=red, **common)
        assert jnp.allclose(o, r, rtol=1e-4, atol=1e-5), (red, o, r)

    # Per-sample weights (weight_reduce_loss 'mean' path).
    w = jax.random.uniform(k5, (N2,), dtype=jnp.float32)
    o_w = jax.block_until_ready(
        sce_loss(x2, y2, weight=w, reduction="mean", tile_n=32, **common))
    r_w = jnp.mean(_sce_loss_ref(x2, y2, reduction="none", **common) * w)
    assert jnp.allclose(o_w, r_w, rtol=1e-4, atol=1e-5), (o_w, r_w)

    # bf16 logits, auto tile: exercises the dtype-aware tile picker (TN % 16)
    # and the in-kernel cast to f32.
    N3, C3 = 64, 40
    x3 = jax.random.normal(k6, (N3, C3), dtype=jnp.float32).astype(jnp.bfloat16)
    y3 = jax.random.randint(k7, (N3,), 0, C3, dtype=jnp.int32)
    o3 = jax.block_until_ready(sce_loss(x3, y3, reduction="mean", **common))
    r3 = _sce_loss_ref(x3, y3, reduction="mean", **common)
    assert jnp.allclose(o3, r3, rtol=1e-3, atol=1e-4), (o3, r3)

    print("KERNEL_OK")
</pallas_src>

<mosaic_0001>
module attributes {stable_mosaic.version = 11 : i64} {
  func.func @_sce_partial_sum_kernel(%arg0: i32, %arg1: memref<8x32xf32, #tpu.memory_space<vmem>>, %arg2: memref<8x1xi32, #tpu.memory_space<vmem>>, %arg3: memref<8x128xf32, #tpu.memory_space<vmem>>) attributes {dimension_semantics = [#tpu.dimension_semantics<parallel>], iteration_bounds = array<i64: 1>, scalar_prefetch = 0 : i64, scratch_operands = 0 : i64, tpu.core_type = #tpu.core_type<tc>, window_params = [{transform_indices = @transform_0, window_bounds = array<i64: 8, 32>}, {transform_indices = @transform_1, window_bounds = array<i64: 8, 1>}, {transform_indices = @transform_2, window_bounds = array<i64: 8, 128>}]} {
    %c0 = arith.constant 0 : index
    %c0_0 = arith.constant 0 : index
    %0 = vector.load %arg1[%c0, %c0_0] : memref<8x32xf32, #tpu.memory_space<vmem>>, vector<8x32xf32>
    %c0_1 = arith.constant 0 : index
    %c0_2 = arith.constant 0 : index
    %1 = vector.load %arg2[%c0_1, %c0_2] : memref<8x1xi32, #tpu.memory_space<vmem>>, vector<8x1xi32>
    %cst = arith.constant dense<0xFF800000> : vector<8xf32>
    %2 = vector.multi_reduction <maximumf>, %0, %cst [1] : vector<8x32xf32> to vector<8xf32>
    %3 = vector.shape_cast %2 : vector<8xf32> to vector<8x1xf32>
    %4 = vector.broadcast %3 : vector<8x1xf32> to vector<8x32xf32>
    %5 = arith.subf %0, %4 : vector<8x32xf32>
    %6 = math.exp %5 : vector<8x32xf32>
    %cst_3 = arith.constant dense<0.000000e+00> : vector<8xf32>
    %7 = vector.multi_reduction <add>, %6, %cst_3 [1] : vector<8x32xf32> to vector<8xf32>
    %8 = vector.shape_cast %7 : vector<8xf32> to vector<8x1xf32>
    %9 = tpu.reciprocal %8 : vector<8x1xf32> -> vector<8x1xf32>
    %10 = math.log %8 : vector<8x1xf32>
    %11 = arith.addf %3, %10 : vector<8x1xf32>
    %12 = tpu.iota {dimensions = array<i32: 1>} : vector<8x32xi32>
    %13 = vector.broadcast %1 : vector<8x1xi32> to vector<8x32xi32>
    %14 = arith.cmpi eq, %12, %13 : vector<8x32xi32>
    %cst_4 = arith.constant 0.000000e+00 : f32
    %15 = vector.broadcast %cst_4 : f32 to vector<8x32xf32>
    %16 = arith.select %14, %0, %15 : vector<8x32xi1>, vector<8x32xf32>
    %cst_5 = arith.constant dense<0.000000e+00> : vector<8xf32>
    %17 = vector.multi_reduction <add>, %16, %cst_5 [1] : vector<8x32xf32> to vector<8xf32>
    %18 = vector.shape_cast %17 : vector<8xf32> to vector<8x1xf32>
    %19 = arith.subf %11, %18 : vector<8x1xf32>
    %cst_6 = arith.constant 1.000000e-07 : f32
    %20 = vector.broadcast %cst_6 : f32 to vector<8x1xf32>
    %21 = arith.mulf %20, %8 : vector<8x1xf32>
    %22 = vector.broadcast %21 : vector<8x1xf32> to vector<8x32xf32>
    %23 = arith.maximumf %6, %22 : vector<8x32xf32>
    %cst_7 = arith.constant dense<0.000000e+00> : vector<8xf32>
    %24 = vector.multi_reduction <add>, %23, %cst_7 [1] : vector<8x32xf32> to vector<8xf32>
    %25 = vector.shape_cast %24 : vector<8xf32> to vector<8x1xf32>
    %26 = arith.mulf %25, %9 : vector<8x1xf32>
    %27 = arith.subf %18, %3 : vector<8x1xf32>
    %28 = math.exp %27 : vector<8x1xf32>
    %29 = arith.maximumf %28, %21 : vector<8x1xf32>
    %30 = arith.mulf %29, %9 : vector<8x1xf32>
    %31 = arith.subf %26, %30 : vector<8x1xf32>
    %cst_8 = arith.constant 9.21034049 : f32
    %32 = vector.broadcast %cst_8 : f32 to vector<8x1xf32>
    %33 = arith.mulf %32, %31 : vector<8x1xf32>
    %cst_9 = arith.constant 5.000000e-01 : f32
    %34 = vector.broadcast %cst_9 : f32 to vector<8x1xf32>
    %35 = arith.mulf %34, %19 : vector<8x1xf32>
    %cst_10 = arith.constant 1.000000e+00 : f32
    %36 = vector.broadcast %cst_10 : f32 to vector<8x1xf32>
    %37 = arith.mulf %36, %33 : vector<8x1xf32>
    %38 = arith.addf %35, %37 : vector<8x1xf32>
    %cst_11 = arith.constant 1.000000e+00 : f32
    %39 = vector.broadcast %cst_11 : f32 to vector<8x1xf32>
    %40 = arith.mulf %39, %38 : vector<8x1xf32>
    %41 = tpu.iota {dimensions = array<i32: 0>} : vector<8x1xi32>
    %c8_i32 = arith.constant 8 : i32
    %42 = arith.muli %arg0, %c8_i32 : i32
    %43 = vector.broadcast %42 : i32 to vector<8x1xi32>
    %44 = arith.addi %43, %41 : vector<8x1xi32>
    %c8_i32_12 = arith.constant 8 : i32
    %45 = vector.broadcast %c8_i32_12 : i32 to vector<8x1xi32>
    %46 = arith.cmpi slt, %44, %45 : vector<8x1xi32>
    %cst_13 = arith.constant 0.000000e+00 : f32
    %47 = vector.broadcast %cst_13 : f32 to vector<8x1xf32>
    %48 = arith.select %46, %40, %47 : vector<8x1xi1>, vector<8x1xf32>
    %cst_14 = arith.constant dense<0.000000e+00> : vector<1xf32>
    %49 = vector.multi_reduction <add>, %48, %cst_14 [0] : vector<8x1xf32> to vector<1xf32>
    %50 = vector.shape_cast %49 : vector<1xf32> to vector<1x1xf32>
    %51 = vector.shape_cast %50 : vector<1x1xf32> to vector<1x1xf32>
    %52 = vector.broadcast %51 : vector<1x1xf32> to vector<8x128xf32>
    %c0_15 = arith.constant 0 : index
    %c0_16 = arith.constant 0 : index
    %53 = vector.load %arg3[%c0_15, %c0_16] : memref<8x128xf32, #tpu.memory_space<vmem>>, vector<8x128xf32>
    tpu.vector_store %arg3[%c0_15, %c0_16], %52 {strides = array<i32>} : memref<8x128xf32, #tpu.memory_space<vmem>>, vector<8x128xf32>,
    return
  }
  func.func @transform_0(%arg0: i32) -> (i32, i32) {
    %c0_i32 = arith.constant 0 : i32
    %c0_i32_0 = arith.constant 0 : i32
    return %arg0, %c0_i32 : i32, i32
  }
  func.func @transform_1(%arg0: i32) -> (i32, i32) {
    %c0_i32 = arith.constant 0 : i32
    %c0_i32_0 = arith.constant 0 : i32
    return %arg0, %c0_i32 : i32, i32
  }
  func.func @transform_2(%arg0: i32) -> (i32, i32) {
    %c0_i32 = arith.constant 0 : i32
    %c0_i32_0 = arith.constant 0 : i32
    return %arg0, %c0_i32 : i32, i32
  }
}

</mosaic_0001>

<bundles_post_ra>
// kernel: tpu_custom_call.1
= control target key start
LH: loop header
LB: loop body
LE: loop exit
PB: predicated region body
PF: predicated region fallthrough
CT: control target
= control target key end

     0   :  { %7 = vsyncpa [#allocation3], 0  ;;  %s252_s0 = inlined_call_operand.hbm [shape: f32[8,32], index: 0, kind: input, shape index: {}]   ;;  %s253_s1 = inlined_call_operand.hbm [shape: s32[8,1], index: 1, kind: input, shape index: {}]   ;;  %s254_s2 = inlined_call_operand.hbm [shape: f32[8,128], index: 2, kind: output, shape index: {}]  }
   0x1   :  { %8 = vsyncpa [#allocation6], 0 }
   0x2   :  { %9 = vsyncpa [#allocation4], 0  ;;  %s193_s9 = smov [#allocation2]   ;;  %s194_s11 = smov [#allocation5]  }
   0x3   :  { %s16_s10 = sshll.u32 %s193_s9, 4  ;;  %s26_s12 = sshll.u32 %s194_s11, 4  ;;  %s17_s10 = int_to_ptr.vmem [resolvable:$true] %s16_s10  ;;  %s27_s12 = int_to_ptr.vmem [resolvable:$true] %s26_s12 }
   0x4   :  { %s121_s15 = scalar_lea.hbm %s252_s0, 128 }
   0x5   :  { %p122_p0 = scmp.ne.s32.totalorder %s252_s0, %s121_s15  ;;  %p125_p1 = scmp.lt.u32.totalorder %s121_s15, %s252_s0 }
   0x7   :  { %p127_p2 = pnand %p125_p1, %p122_p0 }
   0x9   :  { %130 = shalt.err (!%p127_p2)
}
   0xa   :  { %s131_s20 = scalar_lea.vmem %s17_s10, 128  ;;  %p136_p4 = scmp.lt.s32.totalorder %s17_s10, %s17_s10 }
   0xb   :  { %p132_p3 = scmp.ne.s32.totalorder %s17_s10, %s131_s20  ;;  %p137_p5 = scmp.lt.s32.totalorder %s131_s20, %s131_s20 }
   0xd   :  { %p138_p6 = por %p137_p5, %p136_p4 }
   0xf   :  { %p139_p7 = pnand %p138_p6, %p132_p3 }
  0x11   :  { %142 = shalt.err (!%p139_p7)
}
  0x12   :  { %19 = dma.hbm_to_vmem [thread:$0]  %s252_s0, 128, %s17_s10, [#allocation3]  }
  0x13   :  { %s143_s25 = scalar_lea.hbm %s253_s1, 128 }
  0x14   :  { %p144_p8 = scmp.ne.s32.totalorder %s253_s1, %s143_s25  ;;  %p147_p9 = scmp.lt.u32.totalorder %s143_s25, %s253_s1 }
  0x16   :  { %p149_p10 = pnand %p147_p9, %p144_p8 }
  0x18   :  { %152 = shalt.err (!%p149_p10)
}
  0x19   :  { %s153_s30 = scalar_lea.vmem %s27_s12, 128  ;;  %p158_p12 = scmp.lt.s32.totalorder %s27_s12, %s27_s12 }
  0x1a   :  { %p154_p11 = scmp.ne.s32.totalorder %s27_s12, %s153_s30  ;;  %p159_p13 = scmp.lt.s32.totalorder %s153_s30, %s153_s30 }
  0x1c   :  { %p160_p0 = por %p159_p13, %p158_p12 }
  0x1e   :  { %p161_p1 = pnand %p160_p0, %p154_p11 }
  0x20   :  { %164 = shalt.err (!%p161_p1)
}
  0x21   :  { %29 = dma.hbm_to_vmem [thread:$0]  %s253_s1, 128, %s27_s12, [#allocation6]  }
  0x22   :  { %187 = dma.done.wait [#allocation3], 128  }
  0x23   :  { %188 = vsyncadd [#allocation3], 4294967168 }
  0x24   :  { %189 = dma.done.wait [#allocation6], 128  }
  0x25   :  { %190 = vsyncadd [#allocation6], 4294967168  ;;  %v195_v0 = vmov 0   ;;  %vm38_vm0 = vcmask 261120   ;;  %v36_v1 = vld [vmem:[#allocation2] sm:$0xff]  ;;  %v37_v3 = vld [vmem:[#allocation5] sm:$0xff]  ;;  %v52_v7 = vlaneseq }
  0x26   :  { %112 = vset.pattern.permute.xlu0 %v195_v0  ;;  %v39_v2 = vsel %vm38_vm0, %v36_v1, -inf  ;;  %s196_s1 = smov [#allocation7]  }
  0x27   :  { %40 = vmax.xlane.f32.xlu0 %v39_v2  ;;  %v53_v8 = vand.u32 127, %v52_v7  ;;  %s98_s4 = sshll.u32 %s196_s1, 4  ;;  %s99_s4 = int_to_ptr.vmem [resolvable:$true] %s98_s4 }
  0x28   :  { %s165_s5 = scalar_lea.vmem %s99_s4, 128  ;;  %p170_p3 = scmp.lt.s32.totalorder %s99_s4, %s99_s4 }
  0x29   :  { %p166_p2 = scmp.ne.s32.totalorder %s99_s4, %s165_s5  ;;  %p171_p4 = scmp.lt.s32.totalorder %s165_s5, %s165_s5 }
  0x2b   :  { %p172_p5 = por %p171_p4, %p170_p3 }
  0x2d   :  { %p173_p6 = pnand %p172_p5, %p166_p2 }
  0x3d   :  { %55 = vperm.xlu0 %112, %v37_v3  }
  0xb4   :  { %v41_v4 = vpop.xlane.xlu0 %40 }
  0xb5   :  { %v42_v5 = vsub.f32 %v36_v1, %v41_v4 }
  0xb7   :  { %v43_v6 = vmul.f32 1.442695, %v42_v5 }
  0xb9   :  { %113 = vpow2.f32 %v43_v6 }
  0xbc   :  { %v56_v9 = vpop.permute.xlu0 %55 }
  0xbd   :  { %vm57_vm1 = vcmp.eq.s32.totalorder %v53_v8, %v56_v9 }
  0xbe   :  { %v58_v11 = vsel %vm57_vm1, %v36_v1, 0.0 }
  0xbf   :  { %v59_v13 = vsel %vm38_vm0, %v58_v11, 0.0 }
  0xc3   :  { %v114_v10 = vpop.eup %113 }
  0xc4   :  { %v45_v12 = vsel %vm38_vm0, %v114_v10, 0.0 }
  0xc5   :  { %46 = vadd.xlane.f32.xlu1 %v45_v12 }
  0xc9   :  { %60 = vadd.xlane.f32.xlu1 %v59_v13 }
 0x152   :  { %v47_v14 = vpop.xlane.xlu1 %46 }
 0x153   :  { %v63_v15 = vmul.f32 1e-07, %v47_v14 }
 0x155   :  { %v64_v16 = vmax.f32 %v114_v10, %v63_v15 }
 0x156   :  { %v61_v17 = vpop.xlane.xlu1 %60 }
 0x157   :  { %v69_v18 = vsub.f32 %v61_v17, %v41_v4  ;;  %v65_v19 = vsel %vm38_vm0, %v64_v16, 0.0 }
 0x158   :  { %66 = vadd.xlane.f32.xlu1 %v65_v19 }
 0x159   :  { %v70_v20 = vmul.f32 1.442695, %v69_v18 }
 0x15b   :  { %115 = vpow2.f32 %v70_v20 }
 0x15c   :  { %117 = vrcp.f32 %v47_v14 }
 0x15d   :  { %119 = vlog2.f32 %v47_v14 }
 0x165   :  { %v116_v21 = vpop.eup %115 }
 0x166   :  { %v72_v22 = vmax.f32 %v116_v21, %v63_v15  ;;  %v118_v23 = vpop.eup %117 }
 0x167   :  { %v120_v25 = vpop.eup %119 }
 0x168   :  { %v73_v24 = vmul.f32 %v118_v23, %v72_v22  ;;  %v50_v26 = vmul.f32 0.6931472, %v120_v25 }
 0x16a   :  { %v51_v27 = vadd.f32 %v50_v26, %v41_v4 }
 0x16c   :  { %v62_v29 = vsub.f32 %v51_v27, %v61_v17 }
 0x16e   :  { %v76_v32 = vmul.f32 0.5, %v62_v29 }
 0x1e5   :  { %v67_v28 = vpop.xlane.xlu1 %66 }
 0x1e6   :  { %v68_v30 = vmul.f32 %v118_v23, %v67_v28 }
 0x1e8   :  { %v74_v31 = vsub.f32 %v68_v30, %v73_v24 }
 0x1ea   :  { %v75_v33 = vmul.f32 9.2103405, %v74_v31 }
 0x1ec   :  { %v77_v34 = vadd.f32 %v76_v32, %v75_v33 }
 0x1ee   :  { %v85_v35 = vrot.slane %v77_v34, 4 }
 0x1f0   :  { %v86_v36 = vadd.f32 %v85_v35, %v77_v34 }
 0x1f2   :  { %v87_v37 = vrot.slane %v86_v36, 2 }
 0x1f4   :  { %v88_v38 = vadd.f32 %v87_v37, %v86_v36 }
 0x1f6   :  { %v89_v39 = vrot.slane %v88_v38, 1 }
 0x1f8   :  { %v90_v40 = vadd.f32 %v89_v39, %v88_v38 }
 0x1fa   :  { %91 = vst [vmem:[#allocation7] sm:$0xff] %v90_v40 }
 0x1fb   :  { %176 = shalt.err (!%p173_p6)
}
 0x1fc   :  { %s177_s8 = scalar_lea.hbm %s254_s2, 128 }
 0x1fd   :  { %p178_p7 = scmp.ne.s32.totalorder %s254_s2, %s177_s8  ;;  %p181_p8 = scmp.lt.u32.totalorder %s177_s8, %s254_s2 }
 0x1ff   :  { %p183_p9 = pnand %p181_p8, %p178_p7 }
 0x201   :  { %186 = shalt.err (!%p183_p9)
}
 0x202   :  { %101 = dma.vmem_to_hbm [thread:$0]  %s99_s4, 128, %s254_s2, [#allocation4]  }
 0x203   :  { %191 = dma.done.wait [#allocation4], 128  }
 0x204   :  { %192 = vsyncadd [#allocation4], 4294967168 }
 0x205   :  { %105 = vsyncpa [#allocation3], 1 }
 0x206   :  { %106 = vsyncpa [#allocation6], 1 }
 0x207   :  { %107 = vsyncpa [#allocation4], 1 }

</bundles_post_ra>
